<compile_context>
chip_gen: v5e
topology: v5e:2x2
jax: 0.10.0
libtpu: 0.0.40
codegen_flags: <defaults>
</compile_context>

<pallas_src>
import jax
import jax.numpy as jnp
from jax.experimental import pallas as pl
from jax.experimental.pallas import tpu as pltpu


def _vmem_limit_bytes():
    # v7x: 64 MiB physical VMEM per TensorCore -> keep the scoped limit <= 48 MiB
    # v5e/v6e: 128 MiB -> allow 96 MiB so larger resident tiles can pipeline.
    try:
        cap = int(pltpu.get_tpu_info().vmem_capacity_bytes)
    except Exception:
        cap = 128 << 20
    return max(32 << 20, min(96 << 20, (cap * 3) // 4))


VMEM_LIMIT = _vmem_limit_bytes()


def _choose_th(h):
    # Largest row tile (<=16) dividing H; prefer multiples of 8; keep it even so
    # a fused 2x2 pool never straddles row tiles.  (224->16, 112->16, 56->8,
    # 28->14, 16->16, 8->8, 4->4, 2->2.)
    for th in (16, 8, 14, 12, 10, 6, 4, 2):
        if th <= h and h % th == 0:
            return th
    return h


# ----------------------------------------------------------------- conv kernels
def _conv3x3_tile(x_ref, w_ref, b_ref, th, wout, tc, cin):
    """relu(conv3x3 + bias) for one (TH, W, TC) output tile, computed in f32."""
    hi = pl.program_id(2)                                 # row-tile index
    # resident padded image; slice the TH+2 halo'd row window for this tile
    xwin = x_ref[0, pl.ds(hi * th, th + 2)]               # (TH+2, W+2, Cin) bf16
    # bias-initialized accumulator (removes a separate full-tile add)
    acc = jnp.broadcast_to(b_ref[...], (th * wout, tc)).astype(jnp.float32)
    for dh in range(3):
        # lane-concat the three dw shifts -> one K = 3*Cin MXU matmul per dh
        patch = jnp.concatenate(
            [xwin[dh:dh + th, dw:dw + wout, :] for dw in range(3)], axis=-1)
        acc = acc + jnp.dot(patch.reshape(th * wout, 3 * cin), w_ref[dh],
                            preferred_element_type=jnp.float32)
    return jnp.maximum(acc, 0.0).reshape(th, wout, tc)


def conv3x3_relu_kernel(x_ref, w_ref, b_ref, o_ref):
    # x_ref: (1, H+2, W+2, Cin) bf16 (full padded image, resident across ci/hi)
    # w_ref: (3, 3*Cin, TC) bf16 ; b_ref: (1, TC) f32 ; o_ref: (1, TH, W, TC)
    _, th, wout, tc = o_ref.shape
    y = _conv3x3_tile(x_ref, w_ref, b_ref, th, wout, tc, x_ref.shape[3])
    o_ref[0] = y.astype(o_ref.dtype)


def conv3x3_relu_pool_kernel(x_ref, w_ref, b_ref, o_ref, p_ref):
    # Same as above plus a fused 2x2/stride-2 max pool written from the f32 tile
    # (saves the full-resolution HBM re-read a standalone pool pass would do).
    _, th, wout, tc = o_ref.shape
    y = _conv3x3_tile(x_ref, w_ref, b_ref, th, wout, tc, x_ref.shape[3])
    o_ref[0] = y.astype(o_ref.dtype)
    yw = y.reshape(th, wout // 2, 2, tc)
    yw = jnp.maximum(yw[:, :, 0, :], yw[:, :, 1, :])       # reduce W pairs
    yh = yw.reshape(th // 2, 2, wout // 2, tc)
    p_ref[0] = jnp.maximum(yh[:, 0, :, :], yh[:, 1, :, :]).astype(p_ref.dtype)


def matmul_bias_relu_kernel(x_ref, w_ref, b_ref, o_ref):
    # First-layer path: x_ref: (1, TH, W, K=27) im2col patches bf16,
    # w_ref: (K, Cout) bf16, b_ref: (1, Cout) f32, o_ref: (1, TH, W, Cout).
    _, th, wout, cout = o_ref.shape
    k = x_ref.shape[3]
    x = x_ref[0].reshape(th * wout, k)
    acc = jnp.broadcast_to(b_ref[...], (th * wout, cout)).astype(jnp.float32)
    acc = acc + jnp.dot(x, w_ref[...], preferred_element_type=jnp.float32)
    o_ref[0] = jnp.maximum(acc, 0.0).reshape(th, wout, cout).astype(o_ref.dtype)


# --------------------------------------------------------------- conv wrappers
def conv3x3_relu(x, w_hwio, b, pool=False):
    """3x3 SAME conv + bias + ReLU (optionally with fused 2x2/2 max pool).

    x: (N,H,W,Cin) bf16; w_hwio: (3,3,Cin,Cout) f32; b: (Cout,) f32.
    Returns bf16 (N,H,W,Cout) [and bf16 (N,H//2,W//2,Cout) if pool=True].
    """
    N, H, W, Cin = x.shape
    Cout = w_hwio.shape[-1]
    TH = _choose_th(H)
    TC = Cout if Cout <= 128 else 128           # <=128 lanes per Cout tile
    if pool:
        assert H % 2 == 0 and W % 2 == 0 and TH % 2 == 0

    # TODO(synk): the SAME-padding halo is still materialized with jnp.pad in
    # HBM (bf16, half the old cost); an in-kernel halo DMA would remove it.
    xp = jnp.pad(x, ((0, 0), (1, 1), (1, 1), (0, 0)))
    # (3,3,Cin,Cout) -> (3, 3*Cin, Cout): row index = dw*Cin + cin, matching the
    # in-kernel lane-concat order of the three dw shifts.
    w3 = w_hwio.astype(jnp.bfloat16).reshape(3, 3 * Cin, Cout)
    b2 = b.astype(jnp.float32).reshape(1, Cout)

    in_specs = [
        # full padded image of one batch element; block index ignores (ci, hi)
        # so it stays resident in VMEM across the inner grid axes.
        pl.BlockSpec((1, H + 2, W + 2, Cin), lambda n, ci, hi: (n, 0, 0, 0)),
        pl.BlockSpec((3, 3 * Cin, TC), lambda n, ci, hi: (0, 0, ci)),
        pl.BlockSpec((1, TC), lambda n, ci, hi: (0, ci)),
    ]
    if pool:
        kernel = conv3x3_relu_pool_kernel
        out_shape = (jax.ShapeDtypeStruct((N, H, W, Cout), jnp.bfloat16),
                     jax.ShapeDtypeStruct((N, H // 2, W // 2, Cout), jnp.bfloat16))
        out_specs = (
            pl.BlockSpec((1, TH, W, TC), lambda n, ci, hi: (n, hi, 0, ci)),
            pl.BlockSpec((1, TH // 2, W // 2, TC), lambda n, ci, hi: (n, hi, 0, ci)),
        )
    else:
        kernel = conv3x3_relu_kernel
        out_shape = jax.ShapeDtypeStruct((N, H, W, Cout), jnp.bfloat16)
        out_specs = pl.BlockSpec((1, TH, W, TC), lambda n, ci, hi: (n, hi, 0, ci))

    return pl.pallas_call(
        kernel,
        out_shape=out_shape,
        grid=(N, Cout // TC, H // TH),
        in_specs=in_specs,
        out_specs=out_specs,
        compiler_params=pltpu.CompilerParams(
            dimension_semantics=("parallel", "parallel", "parallel"),
            vmem_limit_bytes=VMEM_LIMIT),
    )(xp, w3, b2)


def conv3x3_first(x, w_hwio, b):
    """conv1_1 (Cin=3): wrapper-side im2col to K=27 and a single MXU matmul."""
    N, H, W, Cin = x.shape
    Cout = w_hwio.shape[-1]
    TH = _choose_th(H)
    K = 9 * Cin
    xp = jnp.pad(x, ((0, 0), (1, 1), (1, 1), (0, 0)))
    # channel order (dh, dw, cin) matches w_hwio.reshape(9*Cin, Cout)
    patches = jnp.concatenate(
        [xp[:, dh:dh + H, dw:dw + W, :] for dh in range(3) for dw in range(3)],
        axis=-1)                                           # (N, H, W, 27) bf16
    w2 = w_hwio.astype(jnp.bfloat16).reshape(K, Cout)
    b2 = b.astype(jnp.float32).reshape(1, Cout)
    return pl.pallas_call(
        matmul_bias_relu_kernel,
        out_shape=jax.ShapeDtypeStruct((N, H, W, Cout), jnp.bfloat16),
        grid=(N, H // TH),
        in_specs=[
            pl.BlockSpec((1, TH, W, K), lambda n, hi: (n, hi, 0, 0)),
            pl.BlockSpec((K, Cout), lambda n, hi: (0, 0)),
            pl.BlockSpec((1, Cout), lambda n, hi: (0, 0)),
        ],
        out_specs=pl.BlockSpec((1, TH, W, Cout), lambda n, hi: (n, hi, 0, 0)),
        compiler_params=pltpu.CompilerParams(
            dimension_semantics=("parallel", "parallel"),
            vmem_limit_bytes=VMEM_LIMIT),
    )(patches, w2, b2)


# -------------------------------------------------------------------- the model
# (cin, cout, fused_pool_after) per conv; pools of torch features[4]/[9]/[16]
# are fused into the epilogue of the conv that feeds them.
VGG16_LAYERS = [
    ('relu1_2', [(3, 64, False), (64, 64, True)]),
    ('relu2_2', [(64, 128, False), (128, 128, True)]),
    ('relu3_3', [(128, 256, False), (256, 256, False), (256, 256, True)]),
    ('relu4_3', [(256, 512, False), (512, 512, False), (512, 512, False)]),
]
OUT_NAMES = [name for name, _ in VGG16_LAYERS]


def init_params(key):
    # TODO(synk): pretrained torchvision weights replaced with deterministic
    # He-style random init (identical parameter shapes: OIHW (Cout,Cin,3,3)).
    params = []
    for _, layers in VGG16_LAYERS:
        for cin, cout, _ in layers:
            key, kw, kb = jax.random.split(key, 3)
            w_oihw = jax.random.normal(kw, (cout, cin, 3, 3), jnp.float32)
            w_hwio = jnp.transpose(w_oihw, (2, 3, 1, 0)) * (2.0 / (9 * cin)) ** 0.5
            b = jax.random.normal(kb, (cout,), jnp.float32) * 0.01
            params.append((w_hwio, b))
    return params


def vgg16_forward(x_nchw, params):
    """Pallas implementation. Input NCHW f32, outputs dict of NCHW f32 (like torch)."""
    h = jnp.transpose(x_nchw, (0, 2, 3, 1)).astype(jnp.bfloat16)   # NCHW -> NHWC
    it = iter(params)
    out = {}
    h_pooled = None
    for name, layers in VGG16_LAYERS:
        for cin, cout, pool_after in layers:
            w, b = next(it)
            if cin == 3:
                h = conv3x3_first(h, w, b)
            elif pool_after:
                h, h_pooled = conv3x3_relu(h, w, b, pool=True)
            else:
                h = conv3x3_relu(h, w, b)
        out[name] = jnp.transpose(h, (0, 3, 1, 2)).astype(jnp.float32)
        if layers[-1][2]:                      # next slice starts with a maxpool
            h = h_pooled
    return out


# ------------------------------------------------------------ pure-JAX reference
def vgg16_ref(x_nchw, params):
    """Reference with the same bf16-in / f32-accumulate numerics as the kernels."""
    h = jnp.transpose(x_nchw, (0, 2, 3, 1)).astype(jnp.bfloat16)
    it = iter(params)
    out = {}
    for name, layers in VGG16_LAYERS:
        for _cin, _cout, _pool in layers:
            w, b = next(it)
            y = jax.lax.conv_general_dilated(
                h, w.astype(jnp.bfloat16), window_strides=(1, 1), padding='SAME',
                dimension_numbers=('NHWC', 'HWIO', 'NHWC'),
                preferred_element_type=jnp.float32)
            y = jnp.maximum(y + b[None, None, None, :], 0.0)
            h = y.astype(jnp.bfloat16)
        out[name] = jnp.transpose(h, (0, 3, 1, 2)).astype(jnp.float32)
        if layers[-1][2]:
            N, H, W, C = h.shape
            h = jnp.max(h.reshape(N, H // 2, 2, W // 2, 2, C), axis=(2, 4))
    return out


if __name__ == "__main__":
    key = jax.random.PRNGKey(0)
    kx, kp = jax.random.split(key)
    x = jax.random.normal(kx, (2, 3, 16, 16), jnp.float32)   # NCHW, like torch
    params = init_params(kp)

    out = jax.block_until_ready(vgg16_forward(x, params))
    ref = jax.block_until_ready(vgg16_ref(x, params))

    expected_shapes = {
        'relu1_2': (2, 64, 16, 16),
        'relu2_2': (2, 128, 8, 8),
        'relu3_3': (2, 256, 4, 4),
        'relu4_3': (2, 512, 2, 2),
    }
    for name in OUT_NAMES:
        assert out[name].shape == expected_shapes[name], (name, out[name].shape)
        assert out[name].dtype == jnp.float32, (name, out[name].dtype)
        assert jnp.allclose(out[name], ref[name], rtol=2e-2, atol=2e-2), name

    print("KERNEL_OK")
</pallas_src>

<mosaic_0001>
module attributes {stable_mosaic.version = 11 : i64} {
  func.func @matmul_bias_relu_kernel(%arg0: i32, %arg1: i32, %arg2: memref<1x16x16x27xbf16, #tpu.memory_space<vmem>>, %arg3: memref<27x64xbf16, #tpu.memory_space<vmem>>, %arg4: memref<1x64xf32, #tpu.memory_space<vmem>>, %arg5: memref<1x16x16x64xbf16, #tpu.memory_space<vmem>>) attributes {dimension_semantics = [#tpu.dimension_semantics<parallel>, #tpu.dimension_semantics<parallel>], iteration_bounds = array<i64: 2, 1>, scalar_prefetch = 0 : i64, scratch_operands = 0 : i64, tpu.core_type = #tpu.core_type<tc>, window_params = [{transform_indices = @transform_0, window_bounds = array<i64: 1, 16, 16, 27>}, {pipeline_mode = #tpu.pipeline_mode<synchronous>, transform_indices = @transform_1, window_bounds = array<i64: 27, 64>}, {pipeline_mode = #tpu.pipeline_mode<synchronous>, transform_indices = @transform_2, window_bounds = array<i64: 1, 64>}, {transform_indices = @transform_3, window_bounds = array<i64: 1, 16, 16, 64>}]} {
    %c0 = arith.constant 0 : index
    %c0_0 = arith.constant 0 : index
    %c0_1 = arith.constant 0 : index
    %c0_2 = arith.constant 0 : index
    %0 = vector.load %arg2[%c0, %c0_0, %c0_1, %c0_2] : memref<1x16x16x27xbf16, #tpu.memory_space<vmem>>, vector<1x16x16x27xbf16>
    %1 = vector.shape_cast %0 : vector<1x16x16x27xbf16> to vector<16x16x27xbf16>
    %2 = vector.shape_cast %1 : vector<16x16x27xbf16> to vector<256x27xbf16>
    %c0_3 = arith.constant 0 : index
    %c0_4 = arith.constant 0 : index
    %3 = vector.load %arg4[%c0_3, %c0_4] : memref<1x64xf32, #tpu.memory_space<vmem>>, vector<1x64xf32>
    %4 = vector.shape_cast %3 : vector<1x64xf32> to vector<1x64xf32>
    %5 = vector.broadcast %4 : vector<1x64xf32> to vector<256x64xf32>
    %c0_5 = arith.constant 0 : index
    %c0_6 = arith.constant 0 : index
    %6 = vector.load %arg3[%c0_5, %c0_6] : memref<27x64xbf16, #tpu.memory_space<vmem>>, vector<27x64xbf16>
    %cst = arith.constant dense<0.000000e+00> : vector<256x64xf32>
    %7 = tpu.matmul %2, %6, %cst {dimension_numbers = #tpu.dot_dimension_numbers<[1], [0], [0], [1], [0, 0, 1, 1], [], []>} : vector<256x27xbf16>, vector<27x64xbf16>, vector<256x64xf32> -> vector<256x64xf32>
    %8 = arith.addf %5, %7 : vector<256x64xf32>
    %cst_7 = arith.constant 0.000000e+00 : f32
    %9 = vector.broadcast %cst_7 : f32 to vector<256x64xf32>
    %10 = arith.maximumf %8, %9 : vector<256x64xf32>
    %11 = vector.shape_cast %10 : vector<256x64xf32> to vector<16x16x64xf32>
    %12 = arith.truncf %11 : vector<16x16x64xf32> to vector<16x16x64xbf16>
    %c0_8 = arith.constant 0 : index
    %c0_9 = arith.constant 0 : index
    %c0_10 = arith.constant 0 : index
    %c0_11 = arith.constant 0 : index
    %13 = vector.load %arg5[%c0_8, %c0_9, %c0_10, %c0_11] : memref<1x16x16x64xbf16, #tpu.memory_space<vmem>>, vector<1x16x16x64xbf16>
    %14 = vector.shape_cast %13 : vector<1x16x16x64xbf16> to vector<16x16x64xbf16>
    %15 = vector.shape_cast %12 : vector<16x16x64xbf16> to vector<1x16x16x64xbf16>
    tpu.vector_store %arg5[%c0_8, %c0_9, %c0_10, %c0_11], %15 {strides = array<i32>} : memref<1x16x16x64xbf16, #tpu.memory_space<vmem>>, vector<1x16x16x64xbf16>,
    return
  }
  func.func @transform_0(%arg0: i32, %arg1: i32) -> (i32, i32, i32, i32) {
    %c0_i32 = arith.constant 0 : i32
    %c0_i32_0 = arith.constant 0 : i32
    %c0_i32_1 = arith.constant 0 : i32
    return %arg0, %arg1, %c0_i32, %c0_i32_0 : i32, i32, i32, i32
  }
  func.func @transform_1(%arg0: i32, %arg1: i32) -> (i32, i32) {
    %c0_i32 = arith.constant 0 : i32
    %c0_i32_0 = arith.constant 0 : i32
    %c0_i32_1 = arith.constant 0 : i32
    return %c0_i32, %c0_i32_0 : i32, i32
  }
  func.func @transform_2(%arg0: i32, %arg1: i32) -> (i32, i32) {
    %c0_i32 = arith.constant 0 : i32
    %c0_i32_0 = arith.constant 0 : i32
    %c0_i32_1 = arith.constant 0 : i32
    return %c0_i32, %c0_i32_0 : i32, i32
  }
  func.func @transform_3(%arg0: i32, %arg1: i32) -> (i32, i32, i32, i32) {
    %c0_i32 = arith.constant 0 : i32
    %c0_i32_0 = arith.constant 0 : i32
    %c0_i32_1 = arith.constant 0 : i32
    return %arg0, %arg1, %c0_i32, %c0_i32_0 : i32, i32, i32, i32
  }
}

</mosaic_0001>

<bundles_post_ra>
// kernel: tpu_custom_call.1
= control target key start
LH: loop header
LB: loop body
LE: loop exit
PB: predicated region body
PF: predicated region fallthrough
CT: control target
= control target key end

     0   :  { %s1432_s0 = inlined_call_operand.hbm [shape: bf16[2,16,16,27], index: 0, kind: input, shape index: {}]   ;;  %s1433_s1 = inlined_call_operand.hbm [shape: bf16[27,64], index: 1, kind: input, shape index: {}]   ;;  %s1434_s2 = inlined_call_operand.vmem [shape: f32[1,64], index: 2, kind: input, shape index: {}]   ;;  %s1435_s3 = inlined_call_operand.hbm [shape: bf16[2,16,16,64], index: 3, kind: output, shape index: {}]  }
   0x1   :  { %1437 = sst [smem:[#allocation11_spill]] %s1433_s1 }
   0x2   :  { %8 = vsyncpa [#allocation3], 0 }
   0x3   :  { %10 = vsyncpa [#allocation3 + $0x1], 0 }
   0x4   :  { %11 = vsyncpa [#allocation6], 0 }
   0x5   :  { %12 = vsyncpa [#allocation4], 0 }
   0x6   :  { %14 = vsyncpa [#allocation4 + $0x1], 0  ;;  %s1135_s12 = smov 0   ;;  %s1137_s13 = smov 0  }
   0x7   :  { %s1139_s14 = smov 0   ;;  %s1141_s15 = smov 0  }
   0x8   :  { %s1143_s16 = smov 0   ;;  %s1145_s17 = smov 0  }
   0x9 LB: > { %s751_s18 = sadd.s32 4294967295, %s1107_s17   ;;  %s752_s19 = sadd.s32 4294967294, %s1107_s17   ;;  %s1107_s17 = sphi %s1145_s17, %s20_s17   ;;  %s1103_s16 = sphi %s1143_s16, %s1451_s16   ;;  %s1099_s15 = sphi %s1141_s15, %s1450_s15   ;;  %s1095_s14 = sphi %s1139_s14, %s1449_s14   ;;  %s1091_s13 = sphi %s1137_s13, %s1448_s13   ;;  %s1087_s12 = sphi %s1135_s12, %s1447_s12  }
   0xa   : > { %p54_p0 = scmp.ne.s32.totalorder %s1091_s13, %s1087_s12  ;;  %p1169_p1 = scmp.eq.s32.totalorder %s751_s18, 0 }
   0xb   : > { %p1173_p2 = scmp.eq.s32.totalorder %s751_s18, 1  ;;  %p128_p3 = scmp.eq.s32.totalorder %s752_s19, 1 }
   0xc   : > { %p1179_p4 = por %p1169_p1, %p54_p0  ;;  %p753_p5 = scmp.ge.s32.totalorder %s1107_s17, 1 }
   0xd   : > { %p1184_p6 = por %p128_p3, %p54_p0  ;;  %p135_p7 = scmp.lt.s32.totalorder %s1107_s17, 3 }
   0xe   : > { %s1442_s1 = sld [smem:[#allocation11_spill]]  ;;  %s1109_s28 = smov [#allocation5]  }
   0xf   : > { %p1192_p8 = pnand %p753_p5, %p135_p7  ;;  %s148_s29 = sshll.u32 %s1109_s28, 4  ;;  %s149_s29 = int_to_ptr.vmem [resolvable:$true] %s148_s29 }
  0x10   : > { %p755_p11 = scmp.ge.s32.totalorder %s1107_s17, 2  ;;  %s1436_s30 = smov 64  }
  0x11   : > { %p890_p9 = pneg %p1192_p8  ;;  %s1111_s4 = smov 4  }
  0x12   : > { %s32_s5 = sadd.s32 1, %s1103_s16  ;;  %s41_s6 = sadd.s32 1, %s1095_s14 }
  0x13   : > { %p891_p10 = pnand %p890_p9, %p1169_p1  ;;  %p34_p12 = scmp.ge.s32.totalorder %s32_s5, 2 }
  0x14   : > { %s146_s26 = sshll.u32 %s1442_s1, 4  ;;  %p48_p13 = scmp.ne.s32.totalorder %s1095_s14, %s1091_s13  ;;  %s147_s26 = int_to_ptr.hbm [resolvable:$true] %s146_s26 }
  0x15   : > { %893 = dma.hbm_to_vmem [thread:$0]  (!%p891_p10), %s147_s26, 256, %s149_s29, [#allocation6], %s1436_s30, %s1436_s30, %s1111_s4  }
  0x16   : > { %p49_p0 = scmp.eq.s32.totalorder %s1107_s17, 0  ;;  %s1453_s5 = smov (%p34_p12, %s32_s5), 0 }
  0x17   : > { %p1217_p5 = por %p1173_p2, %p48_p13  ;;  %s36_s9 = ssub.s32 %s1103_s16, %s1453_s5 }
  0x18   : > { %p1211_p3 = por %p49_p0, %p48_p13  ;;  %p903_p7 = scmp.lt.s32.totalorder %s1107_s17, 2 }
  0x19   : > { %p39_p9 = scmp.eq.s32.totalorder %s36_s9, 0  ;;  %s165_s10 = sand.u32 1, %s1095_s14  }
  0x1a   : > { %s756_s11 = sshll.u32 %s165_s10, 7  ;;  %s856_s19 = sshll.u32 %s1103_s16, 7 }
  0x1b   : > { %s1226_s18 = scalar_select %p39_p9, %s1095_s14, %s41_s6  }
  0x1c   : > { %s177_s26 = scalar_lea.hbm %s1432_s0, %s856_s19  ;;  %s169_s28 = scalar_lea.vmem [#allocation2], %s756_s11 }
  0x1d   : > { %s180_s29 = sshll.u32 %s169_s28, 4  ;;  %s178_s21 = sshll.u32 %s177_s26, 4  ;;  %s181_s29 = int_to_ptr.vmem [resolvable:$true] %s180_s29  ;;  %s179_s21 = int_to_ptr.hbm [resolvable:$true] %s178_s21 }
  0x1e   : > { %p895_p2 = pnand %p903_p7, %p1211_p3  ;;  %s166_s30 = scalar_lea.sflag [#allocation3], %s165_s10 }
  0x1f   : > { %s1446_s1 = smov 64   ;;  %192 = sbr.rel (%p1192_p8) target bundleno = 252 (0xfc), region = 32 }
  0x20   : > { %897 = dma.hbm_to_vmem [thread:$0]  (!%p895_p2), %s179_s21, 2048, %s181_s29, %s166_s30, %s1446_s1, %s1446_s1, %s1111_s4  }
  0x21   : > { %s1240_s6 = sand.u32 (!%p1192_p8), 1, %s1091_s13  }
  0x22   : > { %s760_s9 = sshll.u32 (!%p1192_p8), %s1240_s6, 7  ;;  %s195_s11 = scalar_lea.sflag (!%p1192_p8), [#allocation3], %s1240_s6 }
  0x23   : > { %s1246_s7 = scalar_lea.vmem (!%p1192_p8), [#allocation2], %s760_s9 }
  0x24   : > { %1074 = dma.done.wait (%p1179_p4), %s195_s11, 2048  }
  0x25   : > { %1076 = vsyncadd (%p1179_p4), %s195_s11, 4294965248 }
  0x26   : > { %1078 = dma.done.wait (%p1169_p1), [#allocation6], 256  }
  0x27   : > { %1080 = vsyncadd (%p1169_p1), [#allocation6], 4294967040  ;;  %vm410_vm0 = vcmask 1044480   ;;  %vm411_vm1 = vcmask 1045504   ;;  %v1112_v0 = vmov 65535   ;;  %v873_v7 = vld [vmem:[#allocation5] sm:$0xff] }
  0x28   : > { %v412_v1 = vsel %vm410_vm0, 4294967295, %v1112_v0  ;;  %v833_v2 = vld [vmem:[#allocation5 + $0x8] sm:$0xf]  ;;  %v874_v3 = vld [vmem:[#allocation5 + $0x8] sm:$0x30]  ;;  %v857_v8 = vld [vmem:[%s1246_s7] sm:$0xff] }
  0x29   : > { %v413_v4 = vsel %vm411_vm1, %v412_v1, 0  ;;  %v834_v5 = vor.u32 %v874_v3, %v833_v2  ;;  %v861_v9 = vld [vmem:[%s1246_s7 + $0x20] sm:$0xff]  ;;  %vm361_vm2 = vcmask 220160   ;;  %v858_v12 = vld [vmem:[%s1246_s7 + $0x8] sm:$0xff]  ;;  %v859_v16 = vld [vmem:[%s1246_s7 + $0x10] sm:$0xff]  ;;  %vm602_vm3 = vcmask 519168  }
  0x2a   : > { %v865_v10 = vld [vmem:[%s1246_s7 + $0x40] sm:$0xff]  ;;  %v862_v13 = vld [vmem:[%s1246_s7 + $0x28] sm:$0xff]  ;;  %v863_v17 = vld [vmem:[%s1246_s7 + $0x30] sm:$0xff]  ;;  %s1297_s22 = scalar_lea.vmem [#allocation7], %s760_s9  ;;  %s875_s27 = sshll.u32 %s1099_s15, 7 }
  0x2b   : > { %v415_v6 = vand.u32 %v834_v5, %v413_v4  ;;  %v869_v11 = vld [vmem:[%s1246_s7 + $0x60] sm:$0xff]  ;;  %v866_v14 = vld [vmem:[%s1246_s7 + $0x48] sm:$0xff]  ;;  %v867_v18 = vld [vmem:[%s1246_s7 + $0x50] sm:$0xff]  ;;  %s650_s10 = scalar_lea.hbm %s1435_s3, %s875_s27  ;;  %s651_s15 = sshll.u32 %s1297_s22, 4  ;;  %s652_s15 = int_to_ptr.vmem [resolvable:$true] %s651_s15 }
  0x2c   : > { %v870_v15 = vld [vmem:[%s1246_s7 + $0x68] sm:$0xff]  ;;  %v871_v19 = vld [vmem:[%s1246_s7 + $0x70] sm:$0xff]  ;;  %v860_v20 = vld [vmem:[%s1246_s7 + $0x18] sm:$0xff]  ;;  %s653_s19 = sshll.u32 %s650_s10, 4  ;;  %s636_s24 = scalar_lea.sflag [#allocation4], %s1240_s6  ;;  %s654_s19 = int_to_ptr.hbm [resolvable:$true] %s653_s19 }
  0x2d   : > { %423 = vmatpush.bf16.msra.mxu0 %v415_v6  ;;  %876 = vmatpush.bf16.msra.mxu1 %v415_v6  ;;  %v864_v21 = vld [vmem:[%s1246_s7 + $0x38] sm:$0xff]  ;;  %v1291_v24 = vld [vmem:[%s1434_s2] ss:$0 sm:$0xff]  ;;  %s1035_s25 = sshra.s32 %s654_s19, 4  ;;  %s1041_s21 = scalar_lea.hbm %s1435_s3, 256  ;;  %s1036_s25 = int_to_ptr.hbm [resolvable:$true] %s1035_s25 }
  0x2e   : > { %877 = vmatpush.bf16.msra.mxu2 %v415_v6  ;;  %878 = vmatpush.bf16.msra.mxu3 %v415_v6  ;;  %v868_v22 = vld [vmem:[%s1246_s7 + $0x58] sm:$0xff]  ;;  %s1037_s26 = scalar_lea.hbm %s1036_s25, 128  ;;  %p1042_p10 = scmp.lt.s32.totalorder %s1036_s25, %s1435_s3 }
  0x2f   : > { %v872_v23 = vld [vmem:[%s1246_s7 + $0x78] sm:$0xff]  ;;  %p1038_p1 = scmp.ne.s32.totalorder %s1036_s25, %s1037_s26  ;;  %p1043_p12 = scmp.lt.s32.totalorder %s1041_s21, %s1037_s26 }
  0x31   : > { %424 = vmatpush.bf16.msra.mxu0 %v873_v7  ;;  %879 = vmatpush.bf16.msra.mxu1 %v873_v7  ;;  %p1039_p4 = pnand %p1038_p1, %p1217_p5  ;;  %p1044_p13 = por %p1043_p12, %p1042_p10 }
  0x32   : > { %880 = vmatpush.bf16.msra.mxu2 %v873_v7  ;;  %881 = vmatpush.bf16.msra.mxu3 %v873_v7 }
  0x33   : > { %p1040_p8 = pneg %p1039_p4 }
  0x34   : > { %835 = vmatmul.msk.bf16.vlgmr.msra.gmra.mxu0 %vm361_vm2, %v857_v8  ;;  %839 = vmatmul.msk.bf16.vlgmr.msra.gmra.mxu1 %vm361_vm2, %v861_v9 }
  0x35   : > { %843 = vmatmul.msk.bf16.vlgmr.msra.gmra.mxu2 %vm361_vm2, %v865_v10  ;;  %847 = vmatmul.msk.bf16.vlgmr.msra.gmra.mxu3 %vm361_vm2, %v869_v11  ;;  %p1045_p0 = pnand %p1044_p13, %p1040_p8 }
  0x44   : > { %836 = vmatmul.msk.bf16.gmra.mxu0 %vm361_vm2, %v858_v12  ;;  %840 = vmatmul.msk.bf16.gmra.mxu1 %vm361_vm2, %v862_v13 }
  0x45   : > { %844 = vmatmul.msk.bf16.gmra.mxu2 %vm361_vm2, %v866_v14  ;;  %848 = vmatmul.msk.bf16.gmra.mxu3 %vm361_vm2, %v870_v15 }
  0x54   : > { %837 = vmatmul.msk.bf16.gmra.mxu0 %vm361_vm2, %v859_v16  ;;  %841 = vmatmul.msk.bf16.gmra.mxu1 %vm361_vm2, %v863_v17 }
  0x55   : > { %845 = vmatmul.msk.bf16.gmra.mxu2 %vm361_vm2, %v867_v18  ;;  %849 = vmatmul.msk.bf16.gmra.mxu3 %vm361_vm2, %v871_v19 }
  0x64   : > { %838 = vmatmul.msk.bf16.gmra.mxu0 %vm361_vm2, %v860_v20  ;;  %842 = vmatmul.msk.bf16.gmra.mxu1 %vm361_vm2, %v864_v21 }
  0x65   : > { %846 = vmatmul.msk.bf16.gmra.mxu2 %vm361_vm2, %v868_v22  ;;  %850 = vmatmul.msk.bf16.gmra.mxu3 %vm361_vm2, %v872_v23 }
  0xb1   : > { %v426_v25 = vpop.f32.mrf.mxu0  ;;  %v446_v26 = vpop.f32.mrf.mxu1 }
  0xb2   : > { %v506_v27 = vadd.f32 %v1291_v24, %v426_v25  ;;  %v514_v28 = vadd.f32 %v1291_v24, %v446_v26 }
  0xb4   : > { %v538_v29 = vmax.f32 %v506_v27, 0.0  ;;  %v546_v30 = vmax.f32 %v514_v28, 0.0 }
  0xb6   : > { %v570_v31 = vpack.c.bf16 %v538_v29, %v538_v29  ;;  %v578_v32 = vpack.c.bf16 %v546_v30, %v546_v30 }
  0xb8   : > { %603 = vst.msk [vmem:[%s1297_s22] sm:$0xf] %vm602_vm3, %v570_v31  ;;  %v466_v33 = vpop.f32.mrf.mxu2  ;;  %v486_v34 = vpop.f32.mrf.mxu3 }
  0xb9   : > { %611 = vst.msk [vmem:[%s1297_s22 + $0x20] sm:$0xf] %vm602_vm3, %v578_v32  ;;  %v522_v35 = vadd.f32 %v1291_v24, %v466_v33  ;;  %v530_v36 = vadd.f32 %v1291_v24, %v486_v34  ;;  %v428_v37 = vpop.f32.mrf.mxu0  ;;  %v448_v38 = vpop.f32.mrf.mxu1 }
  0xba   : > { %v507_v39 = vadd.f32 %v1291_v24, %v428_v37  ;;  %v515_v40 = vadd.f32 %v1291_v24, %v448_v38 }
  0xbb   : > { %v554_v41 = vmax.f32 %v522_v35, 0.0  ;;  %v562_v42 = vmax.f32 %v530_v36, 0.0 }
  0xbc   : > { %v539_v43 = vmax.f32 %v507_v39, 0.0  ;;  %v547_v44 = vmax.f32 %v515_v40, 0.0 }
  0xbd   : > { %v586_v45 = vpack.c.bf16 %v554_v41, %v554_v41  ;;  %v594_v46 = vpack.c.bf16 %v562_v42, %v562_v42 }
  0xbe   : > { %v571_v47 = vpack.c.bf16 %v539_v43, %v539_v43  ;;  %v579_v48 = vpack.c.bf16 %v547_v44, %v547_v44 }
  0xbf   : > { %619 = vst.msk [vmem:[%s1297_s22 + $0x40] sm:$0xf] %vm602_vm3, %v586_v45 }
  0xc0   : > { %627 = vst.msk [vmem:[%s1297_s22 + $0x60] sm:$0xf] %vm602_vm3, %v594_v46  ;;  %v468_v49 = vpop.f32.mrf.mxu2  ;;  %v488_v50 = vpop.f32.mrf.mxu3 }
  0xc1   : > { %604 = vst.msk [vmem:[%s1297_s22 + $0x4] sm:$0xf] %vm602_vm3, %v571_v47  ;;  %v523_v51 = vadd.f32 %v1291_v24, %v468_v49  ;;  %v531_v52 = vadd.f32 %v1291_v24, %v488_v50  ;;  %v431_v53 = vpop.f32.mrf.mxu0  ;;  %v451_v54 = vpop.f32.mrf.mxu1 }
  0xc2   : > { %612 = vst.msk [vmem:[%s1297_s22 + $0x24] sm:$0xf] %vm602_vm3, %v579_v48  ;;  %v508_v55 = vadd.f32 %v1291_v24, %v431_v53  ;;  %v516_v56 = vadd.f32 %v1291_v24, %v451_v54 }
  0xc3   : > { %v555_v57 = vmax.f32 %v523_v51, 0.0  ;;  %v563_v58 = vmax.f32 %v531_v52, 0.0 }
  0xc4   : > { %v540_v59 = vmax.f32 %v508_v55, 0.0  ;;  %v548_v60 = vmax.f32 %v516_v56, 0.0 }
  0xc5   : > { %v587_v61 = vpack.c.bf16 %v555_v57, %v555_v57  ;;  %v595_v62 = vpack.c.bf16 %v563_v58, %v563_v58 }
  0xc6   : > { %v572_v63 = vpack.c.bf16 %v540_v59, %v540_v59  ;;  %v580_v0 = vpack.c.bf16 %v548_v60, %v548_v60 }
  0xc7   : > { %620 = vst.msk [vmem:[%s1297_s22 + $0x44] sm:$0xf] %vm602_vm3, %v587_v61 }
  0xc8   : > { %628 = vst.msk [vmem:[%s1297_s22 + $0x64] sm:$0xf] %vm602_vm3, %v595_v62  ;;  %v471_v1 = vpop.f32.mrf.mxu2  ;;  %v491_v2 = vpop.f32.mrf.mxu3 }
  0xc9   : > { %605 = vst.msk [vmem:[%s1297_s22 + $0x8] sm:$0xf] %vm602_vm3, %v572_v63  ;;  %v524_v3 = vadd.f32 %v1291_v24, %v471_v1  ;;  %v532_v4 = vadd.f32 %v1291_v24, %v491_v2  ;;  %v433_v5 = vpop.f32.mrf.mxu0  ;;  %v453_v6 = vpop.f32.mrf.mxu1 }
  0xca   : > { %613 = vst.msk [vmem:[%s1297_s22 + $0x28] sm:$0xf] %vm602_vm3, %v580_v0  ;;  %v509_v7 = vadd.f32 %v1291_v24, %v433_v5  ;;  %v517_v8 = vadd.f32 %v1291_v24, %v453_v6 }
  0xcb   : > { %v556_v9 = vmax.f32 %v524_v3, 0.0  ;;  %v564_v10 = vmax.f32 %v532_v4, 0.0 }
  0xcc   : > { %v541_v11 = vmax.f32 %v509_v7, 0.0  ;;  %v549_v12 = vmax.f32 %v517_v8, 0.0 }
  0xcd   : > { %v588_v13 = vpack.c.bf16 %v556_v9, %v556_v9  ;;  %v596_v14 = vpack.c.bf16 %v564_v10, %v564_v10 }
  0xce   : > { %v573_v15 = vpack.c.bf16 %v541_v11, %v541_v11  ;;  %v581_v16 = vpack.c.bf16 %v549_v12, %v549_v12 }
  0xcf   : > { %621 = vst.msk [vmem:[%s1297_s22 + $0x48] sm:$0xf] %vm602_vm3, %v588_v13 }
  0xd0   : > { %629 = vst.msk [vmem:[%s1297_s22 + $0x68] sm:$0xf] %vm602_vm3, %v596_v14  ;;  %v473_v17 = vpop.f32.mrf.mxu2  ;;  %v493_v18 = vpop.f32.mrf.mxu3 }
  0xd1   : > { %606 = vst.msk [vmem:[%s1297_s22 + $0xc] sm:$0xf] %vm602_vm3, %v573_v15  ;;  %v525_v19 = vadd.f32 %v1291_v24, %v473_v17  ;;  %v533_v20 = vadd.f32 %v1291_v24, %v493_v18  ;;  %v436_v21 = vpop.f32.mrf.mxu0  ;;  %v456_v22 = vpop.f32.mrf.mxu1 }
  0xd2   : > { %614 = vst.msk [vmem:[%s1297_s22 + $0x2c] sm:$0xf] %vm602_vm3, %v581_v16  ;;  %v510_v23 = vadd.f32 %v1291_v24, %v436_v21  ;;  %v518_v25 = vadd.f32 %v1291_v24, %v456_v22 }
  0xd3   : > { %v557_v26 = vmax.f32 %v525_v19, 0.0  ;;  %v565_v27 = vmax.f32 %v533_v20, 0.0 }
  0xd4   : > { %v542_v28 = vmax.f32 %v510_v23, 0.0  ;;  %v550_v29 = vmax.f32 %v518_v25, 0.0 }
  0xd5   : > { %v589_v30 = vpack.c.bf16 %v557_v26, %v557_v26  ;;  %v597_v31 = vpack.c.bf16 %v565_v27, %v565_v27 }
  0xd6   : > { %v574_v32 = vpack.c.bf16 %v542_v28, %v542_v28  ;;  %v582_v33 = vpack.c.bf16 %v550_v29, %v550_v29 }
  0xd7   : > { %622 = vst.msk [vmem:[%s1297_s22 + $0x4c] sm:$0xf] %vm602_vm3, %v589_v30 }
  0xd8   : > { %630 = vst.msk [vmem:[%s1297_s22 + $0x6c] sm:$0xf] %vm602_vm3, %v597_v31  ;;  %v476_v34 = vpop.f32.mrf.mxu2  ;;  %v496_v35 = vpop.f32.mrf.mxu3 }
  0xd9   : > { %607 = vst.msk [vmem:[%s1297_s22 + $0x10] sm:$0xf] %vm602_vm3, %v574_v32  ;;  %v526_v36 = vadd.f32 %v1291_v24, %v476_v34  ;;  %v534_v37 = vadd.f32 %v1291_v24, %v496_v35  ;;  %v438_v38 = vpop.f32.mrf.mxu0  ;;  %v458_v39 = vpop.f32.mrf.mxu1 }
  0xda   : > { %615 = vst.msk [vmem:[%s1297_s22 + $0x30] sm:$0xf] %vm602_vm3, %v582_v33  ;;  %v511_v40 = vadd.f32 %v1291_v24, %v438_v38  ;;  %v519_v41 = vadd.f32 %v1291_v24, %v458_v39 }
  0xdb   : > { %v558_v42 = vmax.f32 %v526_v36, 0.0  ;;  %v566_v43 = vmax.f32 %v534_v37, 0.0 }
  0xdc   : > { %v543_v44 = vmax.f32 %v511_v40, 0.0  ;;  %v551_v45 = vmax.f32 %v519_v41, 0.0 }
  0xdd   : > { %v590_v46 = vpack.c.bf16 %v558_v42, %v558_v42  ;;  %v598_v47 = vpack.c.bf16 %v566_v43, %v566_v43 }
  0xde   : > { %v575_v48 = vpack.c.bf16 %v543_v44, %v543_v44  ;;  %v583_v49 = vpack.c.bf16 %v551_v45, %v551_v45 }
  0xdf   : > { %623 = vst.msk [vmem:[%s1297_s22 + $0x50] sm:$0xf] %vm602_vm3, %v590_v46 }
  0xe0   : > { %631 = vst.msk [vmem:[%s1297_s22 + $0x70] sm:$0xf] %vm602_vm3, %v598_v47  ;;  %v478_v50 = vpop.f32.mrf.mxu2  ;;  %v498_v51 = vpop.f32.mrf.mxu3 }
  0xe1   : > { %608 = vst.msk [vmem:[%s1297_s22 + $0x14] sm:$0xf] %vm602_vm3, %v575_v48  ;;  %v527_v52 = vadd.f32 %v1291_v24, %v478_v50  ;;  %v535_v53 = vadd.f32 %v1291_v24, %v498_v51  ;;  %v441_v54 = vpop.f32.mrf.mxu0  ;;  %v461_v55 = vpop.f32.mrf.mxu1 }
  0xe2   : > { %616 = vst.msk [vmem:[%s1297_s22 + $0x34] sm:$0xf] %vm602_vm3, %v583_v49  ;;  %v512_v56 = vadd.f32 %v1291_v24, %v441_v54  ;;  %v520_v57 = vadd.f32 %v1291_v24, %v461_v55 }
  0xe3   : > { %v559_v58 = vmax.f32 %v527_v52, 0.0  ;;  %v567_v59 = vmax.f32 %v535_v53, 0.0 }
  0xe4   : > { %v544_v60 = vmax.f32 %v512_v56, 0.0  ;;  %v552_v61 = vmax.f32 %v520_v57, 0.0 }
  0xe5   : > { %v591_v62 = vpack.c.bf16 %v559_v58, %v559_v58  ;;  %v599_v63 = vpack.c.bf16 %v567_v59, %v567_v59 }
  0xe6   : > { %v576_v0 = vpack.c.bf16 %v544_v60, %v544_v60  ;;  %v584_v1 = vpack.c.bf16 %v552_v61, %v552_v61 }
  0xe7   : > { %624 = vst.msk [vmem:[%s1297_s22 + $0x54] sm:$0xf] %vm602_vm3, %v591_v62 }
  0xe8   : > { %632 = vst.msk [vmem:[%s1297_s22 + $0x74] sm:$0xf] %vm602_vm3, %v599_v63  ;;  %v481_v2 = vpop.f32.mrf.mxu2  ;;  %v501_v3 = vpop.f32.mrf.mxu3 }
  0xe9   : > { %609 = vst.msk [vmem:[%s1297_s22 + $0x18] sm:$0xf] %vm602_vm3, %v576_v0  ;;  %v528_v4 = vadd.f32 %v1291_v24, %v481_v2  ;;  %v536_v5 = vadd.f32 %v1291_v24, %v501_v3  ;;  %v443_v6 = vpop.f32.mrf.mxu0  ;;  %v463_v7 = vpop.f32.mrf.mxu1 }
  0xea   : > { %617 = vst.msk [vmem:[%s1297_s22 + $0x38] sm:$0xf] %vm602_vm3, %v584_v1  ;;  %v513_v8 = vadd.f32 %v1291_v24, %v443_v6  ;;  %v521_v9 = vadd.f32 %v1291_v24, %v463_v7 }
  0xeb   : > { %v560_v10 = vmax.f32 %v528_v4, 0.0  ;;  %v568_v11 = vmax.f32 %v536_v5, 0.0 }
  0xec   : > { %v545_v12 = vmax.f32 %v513_v8, 0.0  ;;  %v553_v13 = vmax.f32 %v521_v9, 0.0 }
  0xed   : > { %v592_v14 = vpack.c.bf16 %v560_v10, %v560_v10  ;;  %v600_v15 = vpack.c.bf16 %v568_v11, %v568_v11 }
  0xee   : > { %v577_v16 = vpack.c.bf16 %v545_v12, %v545_v12  ;;  %v585_v17 = vpack.c.bf16 %v553_v13, %v553_v13 }
  0xef   : > { %625 = vst.msk [vmem:[%s1297_s22 + $0x58] sm:$0xf] %vm602_vm3, %v592_v14 }
  0xf0   : > { %633 = vst.msk [vmem:[%s1297_s22 + $0x78] sm:$0xf] %vm602_vm3, %v600_v15  ;;  %v483_v18 = vpop.f32.mrf.mxu2  ;;  %v503_v19 = vpop.f32.mrf.mxu3 }
  0xf1   : > { %610 = vst.msk [vmem:[%s1297_s22 + $0x1c] sm:$0xf] %vm602_vm3, %v577_v16  ;;  %v529_v20 = vadd.f32 %v1291_v24, %v483_v18  ;;  %v537_v21 = vadd.f32 %v1291_v24, %v503_v19 }
  0xf2   : > { %618 = vst.msk [vmem:[%s1297_s22 + $0x3c] sm:$0xf] %vm602_vm3, %v585_v17 }
  0xf3   : > { %v561_v22 = vmax.f32 %v529_v20, 0.0  ;;  %v569_v23 = vmax.f32 %v537_v21, 0.0 }
  0xf5   : > { %v593_v25 = vpack.c.bf16 %v561_v22, %v561_v22  ;;  %v601_v26 = vpack.c.bf16 %v569_v23, %v569_v23 }
  0xf7   : > { %626 = vst.msk [vmem:[%s1297_s22 + $0x5c] sm:$0xf] %vm602_vm3, %v593_v25 }
  0xf8   : > { %634 = vst.msk [vmem:[%s1297_s22 + $0x7c] sm:$0xf] %vm602_vm3, %v601_v26 }
  0xf9   : > { %1048 = shalt.err (!%p1045_p0)
}
  0xfa   : > { %s1113_s6 = smov 64   ;;  %s1114_s7 = smov 4  }
  0xfb   : > { %888 = dma.vmem_to_hbm [thread:$0]  (%p1217_p5), %s652_s15, 2048, %s654_s19, %s636_s24, %s1113_s6, %s1113_s6, %s1114_s7  }
  0xfc PF: > { %s668_s1 = sand.u32 1, %s1087_s12   ;;  %p899_p3 = pnand %p755_p11, %p1184_p6 }
  0xfd   : > { %s669_s20 = scalar_lea.sflag [#allocation4], %s668_s1 }
  0xfe   : > { %p900_p7 = pneg %p899_p3 }
 0x100   : > { %1082 = dma.done.wait (%p900_p7), %s669_s20, 2048  }
 0x101   : > { %1084 = vsyncadd (%p900_p7), %s669_s20, 4294965248  ;;  %s20_s17 = sadd.s32 1, %s1107_s17   ;;  %s1447_s12 = smov %s1091_s13 }
 0x102   : > { %p17_p9 = scmp.ge.s32.totalorder %s20_s17, 4   ;;  %s1448_s13 = smov %s1095_s14 }
 0x103   : > { %s1449_s14 = smov %s1226_s18  ;;  %s1450_s15 = smov %s1103_s16 }
 0x104   : > { %s1451_s16 = smov %s1453_s5  ;;  %19 = sbr.rel (!%p17_p9) target bundleno = 9 (0x9), region = 81 }
 0x109   :  { %675 = vsyncpa [#allocation3], 1 }
 0x10a   :  { %677 = vsyncpa [#allocation3 + $0x1], 1 }
 0x10b   :  { %678 = vsyncpa [#allocation6], 1 }
 0x10c   :  { %679 = vsyncpa [#allocation4], 1 }
 0x10d   :  { %681 = vsyncpa [#allocation4 + $0x1], 1 }

</bundles_post_ra>
